<compile_context>
chip_gen: v7x
topology: tpu7x:2x2x1
jax: 0.10.0
libtpu: 0.0.40
codegen_flags: <defaults>
</compile_context>

<pallas_src>
import functools

import jax
import jax.numpy as jnp
from jax import lax
from jax.experimental import pallas as pl
from jax.experimental.pallas import tpu as pltpu

GAMMA = 1.5
ALPHA = 0.25
LANES = 128
SUB = 512          # rows per inner sub-slice (bounds VMEM intermediates)


def _round_up(x, m):
    return ((x + m - 1) // m) * m


def _cdiv(a, b):
    return -(-a // b)


def _plan(total, tile_rows):
    """Choose (rows_alloc, tm, sub, steps_total, steps_per_chunk, chunks,
    valid_rows_last, pad_elems)."""
    rows = _cdiv(total, LANES)
    cap = max(SUB, _round_up(tile_rows, SUB))

    no_pad = (rows * LANES == total) and (rows % 8 == 0)
    rows_base = rows if no_pad else _round_up(rows, 8)

    tm = min(cap, _round_up(rows_base, SUB))
    if tm > rows_base:
        tm = rows_base                       # rows_base is a multiple of 8
    sub = min(SUB, tm)
    while tm % sub:                          # tm, sub multiples of 8 -> terminates
        sub -= 8

    steps_total = _cdiv(rows_base, tm)
    if no_pad:
        rows_alloc = rows                    # keep array as-is; last block may be partial
        valid_rows_last = rows - (steps_total - 1) * tm
        pad_elems = 0
    else:
        rows_alloc = steps_total * tm        # fully value-padded; all blocks full
        valid_rows_last = tm
        pad_elems = rows_alloc * LANES - total

    chunks = 2 if steps_total >= 2 else 1
    steps_per_chunk = _cdiv(steps_total, chunks)
    return (rows_alloc, tm, sub, steps_total, steps_per_chunk, chunks,
            valid_rows_last, pad_elems)


def _focal_loss_kernel(pred_ref, true_ref, out_ref, *,
                       tm, sub, chunks, steps_total, steps_per_chunk,
                       valid_rows_last):
    c = pl.program_id(0)                     # parallel chunk axis (v7x megacore)
    i = pl.program_id(1)                     # reduction axis within a chunk
    step = c * steps_per_chunk + i

    @pl.when(i == 0)
    def _init():
        out_ref[...] = jnp.zeros_like(out_ref)

    def tile_partial_sum(n_sub, row_limit):
        """Sum focal loss over n_sub sub-slices of the current (tm,128) tile,
        folded onto an (8,128) vreg accumulator (pure VPU adds)."""
        def body(s, acc):
            r0 = pl.multiple_of(s * sub, 8)
            x = pred_ref[pl.ds(r0, sub), :].astype(jnp.float32)
            y = true_ref[pl.ds(r0, sub), :].astype(jnp.float32)

            e = jnp.exp(-jnp.abs(x))                 # shared transcendental
            # Hard 0/1 labels: z = x for y==0, -x for y==1
            z = jnp.where(y >= 0.5, -x, x)
            # Stable BCEWithLogits (reduction='none'):
            bce = jnp.maximum(z, 0.0) + jnp.log1p(e)

            # 1 - p_t == sigmoid(z); reciprocal on the EUP + one Newton step.
            d = 1.0 + e
            r = pl.reciprocal(d, approx=True)
            inv = r * (2.0 - d * r)                  # ~f32-accurate 1/(1+e)
            m = jnp.where(z >= 0.0, inv, e * inv)    # sigmoid(z)

            alpha_factor = 0.75 - 0.5 * y            # y*0.25 + (1-y)*0.75
            # (1 - p_t) ** 1.5 computed exactly as m * sqrt(m)
            loss = bce * alpha_factor * (m * jnp.sqrt(m))

            if row_limit is not None:
                # Only emitted for the single partial boundary tile.
                rr = lax.broadcasted_iota(jnp.int32, (sub, LANES), 0) + r0
                loss = jnp.where(rr < row_limit, loss, 0.0)

            return acc + loss.reshape(sub // 8, 8, LANES).sum(axis=0)

        return lax.fori_loop(0, n_sub, body,
                             jnp.zeros((8, LANES), jnp.float32))

    n_sub_full = tm // sub
    has_tail = valid_rows_last < tm
    has_dummy = chunks * steps_per_chunk > steps_total

    if has_tail:
        @pl.when(step < steps_total - 1)
        def _full():
            out_ref[...] += tile_partial_sum(n_sub_full, None)

        n_sub_tail = _cdiv(valid_rows_last, sub)

        @pl.when(step == steps_total - 1)
        def _tail():
            out_ref[...] += tile_partial_sum(n_sub_tail, valid_rows_last)
        # steps >= steps_total (dummy) fall through and do nothing.
    elif has_dummy:
        @pl.when(step < steps_total)
        def _full():
            out_ref[...] += tile_partial_sum(n_sub_full, None)
    else:
        out_ref[...] += tile_partial_sum(n_sub_full, None)


def focal_loss(pred, true, *, tile_rows=8192):
    """pred, true: arrays of identical shape (e.g. NCHW); true is a 0/1 mask.
    Returns the scalar mean focal loss (gamma=1.5, alpha=0.25, BCEWithLogits)."""
    assert pred.shape == true.shape
    total = pred.size
    assert total > 0

    # Stream in native float dtype (no wrapper bf16 cast pass).
    if pred.dtype not in (jnp.float32, jnp.bfloat16):
        pred = pred.astype(jnp.float32)
    if true.dtype not in (jnp.float32, jnp.bfloat16):
        true = true.astype(jnp.float32)

    (rows_alloc, tm, sub, steps_total, spc, chunks,
     valid_rows_last, pad) = _plan(total, tile_rows)

    pred_flat = pred.reshape(-1)
    true_flat = true.reshape(-1)
    if pad:
        # Value padding: x=-100, y=0 gives a focal term of exactly 0, so the
        # padded elements need no in-kernel masking.
        pred_flat = jnp.pad(pred_flat, (0, pad), constant_values=-100.0)
        true_flat = jnp.pad(true_flat, (0, pad), constant_values=0)

    pred2d = pred_flat.reshape(rows_alloc, LANES)
    true2d = true_flat.reshape(rows_alloc, LANES)

    kernel = functools.partial(
        _focal_loss_kernel, tm=tm, sub=sub, chunks=chunks,
        steps_total=steps_total, steps_per_chunk=spc,
        valid_rows_last=valid_rows_last)

    # Clamp dummy steps (odd total step count split over 2 chunks) onto a
    # valid block; the kernel skips their accumulation.
    idx = lambda c, i: (jnp.minimum(c * spc + i, steps_total - 1), 0)

    bytes_accessed = (pred2d.size * pred2d.dtype.itemsize
                      + true2d.size * true2d.dtype.itemsize
                      + chunks * 8 * LANES * 4)
    cost = pl.CostEstimate(flops=20 * total,
                           transcendentals=4 * total,
                           bytes_accessed=bytes_accessed)

    partials = pl.pallas_call(
        kernel,
        out_shape=jax.ShapeDtypeStruct((chunks, 8, LANES), jnp.float32),
        grid_spec=pltpu.PrefetchScalarGridSpec(
            num_scalar_prefetch=0,
            grid=(chunks, spc),
            in_specs=[
                pl.BlockSpec((tm, LANES), idx),
                pl.BlockSpec((tm, LANES), idx),
            ],
            out_specs=pl.BlockSpec((None, 8, LANES), lambda c, i: (c, 0, 0)),
        ),
        compiler_params=pltpu.CompilerParams(
            dimension_semantics=("parallel", "arbitrary"),
            vmem_limit_bytes=32 * 1024 * 1024,
        ),
        cost_estimate=cost,
    )(pred2d, true2d)

    total_sum = jnp.sum(partials, dtype=jnp.float32)
    # original loss_fcn.reduction == 'mean'
    return total_sum / jnp.float32(total)


def _focal_loss_ref(pred, true):
    x = pred.astype(jnp.float32)
    y = true.astype(jnp.float32)
    bce = jnp.maximum(x, 0.0) - x * y + jnp.log1p(jnp.exp(-jnp.abs(x)))
    p = jax.nn.sigmoid(x)
    p_t = y * p + (1.0 - y) * (1.0 - p)
    alpha_factor = y * ALPHA + (1.0 - y) * (1.0 - ALPHA)
    loss = bce * alpha_factor * (1.0 - p_t) ** GAMMA
    return loss.mean()


if __name__ == "__main__":
    key = jax.random.PRNGKey(0)
    k1, k2, k3, k4 = jax.random.split(key, 4)

    # NCHW: batch=2, channels=4, spatial=16x16 (lane-aligned, no wrapper pad)
    pred = jax.random.normal(k1, (2, 4, 16, 16), dtype=jnp.float32) * 2.0
    true = (jax.random.uniform(k2, (2, 4, 16, 16)) > 0.7).astype(jnp.float32)

    out = focal_loss(pred, true)
    out = jax.block_until_ready(out)
    ref = _focal_loss_ref(pred, true)
    assert jnp.allclose(out, ref, rtol=1e-4, atol=1e-7), (out, ref)

    # Ragged shape exercising the value-padding path (total % 128 != 0)
    pred2 = jax.random.normal(k3, (2, 3, 15, 15), dtype=jnp.float32) * 2.0
    true2 = (jax.random.uniform(k4, (2, 3, 15, 15)) > 0.7).astype(jnp.float32)

    out2 = focal_loss(pred2, true2)
    out2 = jax.block_until_ready(out2)
    ref2 = _focal_loss_ref(pred2, true2)
    assert jnp.allclose(out2, ref2, rtol=1e-4, atol=1e-7), (out2, ref2)

    print("KERNEL_OK")
</pallas_src>

<mosaic_0001>
module attributes {stable_mosaic.version = 11 : i64} {
  func.func @_focal_loss_kernel(%arg0: i32, %arg1: i32, %arg2: memref<16x128xf32, #tpu.memory_space<vmem>>, %arg3: memref<16x128xf32, #tpu.memory_space<vmem>>, %arg4: memref<1x8x128xf32, #tpu.memory_space<vmem>>) attributes {dimension_semantics = [#tpu.dimension_semantics<parallel>, #tpu.dimension_semantics<arbitrary>], iteration_bounds = array<i64: 1, 1>, scalar_prefetch = 0 : i64, scratch_operands = 0 : i64, tpu.core_type = #tpu.core_type<tc>, window_params = [{transform_indices = @transform_0, window_bounds = array<i64: 16, 128>}, {transform_indices = @transform_1, window_bounds = array<i64: 16, 128>}, {transform_indices = @transform_2, window_bounds = array<i64: 1, 8, 128>}]} {
    %c0_i32 = arith.constant 0 : i32
    %0 = arith.cmpi eq, %arg1, %c0_i32 : i32
    %1 = arith.extui %0 : i1 to i32
    %c0_i32_0 = arith.constant 0 : i32
    %2 = arith.cmpi ne, %1, %c0_i32_0 : i32
    scf.if %2 {
      %cst_19 = arith.constant 0.000000e+00 : f32
      %51 = vector.broadcast %cst_19 : f32 to vector<8x128xf32>
      %c0_20 = arith.constant 0 : index
      %c0_21 = arith.constant 0 : index
      %c0_22 = arith.constant 0 : index
      %52 = vector.load %arg4[%c0_20, %c0_21, %c0_22] : memref<1x8x128xf32, #tpu.memory_space<vmem>>, vector<1x8x128xf32>
      %53 = vector.shape_cast %52 : vector<1x8x128xf32> to vector<8x128xf32>
      %54 = vector.shape_cast %51 : vector<8x128xf32> to vector<1x8x128xf32>
      tpu.vector_store %arg4[%c0_20, %c0_21, %c0_22], %54 {strides = array<i32>} : memref<1x8x128xf32, #tpu.memory_space<vmem>>, vector<1x8x128xf32>,
    } else {
    }
    %c0 = arith.constant 0 : index
    %c0_1 = arith.constant 0 : index
    %c0_2 = arith.constant 0 : index
    %3 = vector.load %arg4[%c0, %c0_1, %c0_2] : memref<1x8x128xf32, #tpu.memory_space<vmem>>, vector<1x8x128xf32>
    %4 = vector.shape_cast %3 : vector<1x8x128xf32> to vector<8x128xf32>
    %cst = arith.constant 0.000000e+00 : f32
    %5 = vector.broadcast %cst : f32 to vector<8x128xf32>
    %c0_i32_3 = arith.constant 0 : i32
    %c16_i32 = arith.constant 16 : i32
    %6 = arith.muli %c0_i32_3, %c16_i32 : i32
    %7 = tpu.assume_multiple %6, 8 : i32
    %8 = arith.index_cast %7 : i32 to index
    %c0_4 = arith.constant 0 : index
    %9 = vector.load %arg2[%8, %c0_4] : memref<16x128xf32, #tpu.memory_space<vmem>>, vector<16x128xf32>
    %10 = arith.index_cast %7 : i32 to index
    %c0_5 = arith.constant 0 : index
    %11 = vector.load %arg3[%10, %c0_5] : memref<16x128xf32, #tpu.memory_space<vmem>>, vector<16x128xf32>
    %12 = math.absf %9 : vector<16x128xf32>
    %cst_6 = arith.constant 0.000000e+00 : f32
    %13 = vector.broadcast %cst_6 : f32 to vector<16x128xf32>
    %14 = arith.subf %13, %12 : vector<16x128xf32>
    %15 = math.exp %14 : vector<16x128xf32>
    %cst_7 = arith.constant 5.000000e-01 : f32
    %16 = vector.broadcast %cst_7 : f32 to vector<16x128xf32>
    %17 = arith.cmpf oge, %11, %16 : vector<16x128xf32>
    %cst_8 = arith.constant 0.000000e+00 : f32
    %18 = vector.broadcast %cst_8 : f32 to vector<16x128xf32>
    %19 = arith.subf %18, %9 : vector<16x128xf32>
    %20 = arith.select %17, %19, %9 : vector<16x128xi1>, vector<16x128xf32>
    %cst_9 = arith.constant 0.000000e+00 : f32
    %21 = vector.broadcast %cst_9 : f32 to vector<16x128xf32>
    %22 = arith.maximumf %20, %21 : vector<16x128xf32>
    %23 = math.log1p %15 : vector<16x128xf32>
    %24 = arith.addf %22, %23 : vector<16x128xf32>
    %cst_10 = arith.constant 1.000000e+00 : f32
    %25 = vector.broadcast %cst_10 : f32 to vector<16x128xf32>
    %26 = arith.addf %25, %15 : vector<16x128xf32>
    %27 = tpu.reciprocal %26 {approx = true} : vector<16x128xf32> -> vector<16x128xf32>
    %28 = arith.mulf %26, %27 : vector<16x128xf32>
    %cst_11 = arith.constant 2.000000e+00 : f32
    %29 = vector.broadcast %cst_11 : f32 to vector<16x128xf32>
    %30 = arith.subf %29, %28 : vector<16x128xf32>
    %31 = arith.mulf %27, %30 : vector<16x128xf32>
    %cst_12 = arith.constant 0.000000e+00 : f32
    %32 = vector.broadcast %cst_12 : f32 to vector<16x128xf32>
    %33 = arith.cmpf oge, %20, %32 : vector<16x128xf32>
    %34 = arith.mulf %15, %31 : vector<16x128xf32>
    %35 = arith.select %33, %31, %34 : vector<16x128xi1>, vector<16x128xf32>
    %cst_13 = arith.constant 5.000000e-01 : f32
    %36 = vector.broadcast %cst_13 : f32 to vector<16x128xf32>
    %37 = arith.mulf %36, %11 : vector<16x128xf32>
    %cst_14 = arith.constant 7.500000e-01 : f32
    %38 = vector.broadcast %cst_14 : f32 to vector<16x128xf32>
    %39 = arith.subf %38, %37 : vector<16x128xf32>
    %40 = arith.mulf %24, %39 : vector<16x128xf32>
    %41 = math.sqrt %35 : vector<16x128xf32>
    %42 = arith.mulf %35, %41 : vector<16x128xf32>
    %43 = arith.mulf %40, %42 : vector<16x128xf32>
    %44 = vector.shape_cast %43 : vector<16x128xf32> to vector<2x8x128xf32>
    %cst_15 = arith.constant dense<0.000000e+00> : vector<8x128xf32>
    %45 = vector.multi_reduction <add>, %44, %cst_15 [0] : vector<2x8x128xf32> to vector<8x128xf32>
    %46 = arith.addf %5, %45 : vector<8x128xf32>
    %c1_i32 = arith.constant 1 : i32
    %47 = arith.addf %4, %46 : vector<8x128xf32>
    %c0_16 = arith.constant 0 : index
    %c0_17 = arith.constant 0 : index
    %c0_18 = arith.constant 0 : index
    %48 = vector.load %arg4[%c0_16, %c0_17, %c0_18] : memref<1x8x128xf32, #tpu.memory_space<vmem>>, vector<1x8x128xf32>
    %49 = vector.shape_cast %48 : vector<1x8x128xf32> to vector<8x128xf32>
    %50 = vector.shape_cast %47 : vector<8x128xf32> to vector<1x8x128xf32>
    tpu.vector_store %arg4[%c0_16, %c0_17, %c0_18], %50 {strides = array<i32>} : memref<1x8x128xf32, #tpu.memory_space<vmem>>, vector<1x8x128xf32>,
    return
  }
  func.func @transform_0(%arg0: i32, %arg1: i32) -> (i32, i32) {
    %c1_i32 = arith.constant 1 : i32
    %0 = arith.muli %arg0, %c1_i32 : i32
    %1 = arith.addi %0, %arg1 : i32
    %c0_i32 = arith.constant 0 : i32
    %2 = arith.minsi %1, %c0_i32 : i32
    %c0_i32_0 = arith.constant 0 : i32
    %c0_i32_1 = arith.constant 0 : i32
    return %2, %c0_i32_0 : i32, i32
  }
  func.func @transform_1(%arg0: i32, %arg1: i32) -> (i32, i32) {
    %c1_i32 = arith.constant 1 : i32
    %0 = arith.muli %arg0, %c1_i32 : i32
    %1 = arith.addi %0, %arg1 : i32
    %c0_i32 = arith.constant 0 : i32
    %2 = arith.minsi %1, %c0_i32 : i32
    %c0_i32_0 = arith.constant 0 : i32
    %c0_i32_1 = arith.constant 0 : i32
    return %2, %c0_i32_0 : i32, i32
  }
  func.func @transform_2(%arg0: i32, %arg1: i32) -> (i32, i32, i32) {
    %c0_i32 = arith.constant 0 : i32
    %c0_i32_0 = arith.constant 0 : i32
    %c0_i32_1 = arith.constant 0 : i32
    return %arg0, %c0_i32, %c0_i32_0 : i32, i32, i32
  }
}

</mosaic_0001>

<bundles_post_ra>
// kernel: tpu_custom_call.1
= control target key start
LH: loop header
LB: loop body
LE: loop exit
PB: predicated region body
PF: predicated region fallthrough
CT: control target
= control target key end

     0   :  { %7 = vsyncpa [#allocation3], 0  ;;  %s320_s0 = inlined_call_operand.hbm [shape: f32[16,128], index: 0, kind: input, shape index: {}]   ;;  %s321_s1 = inlined_call_operand.hbm [shape: f32[16,128], index: 1, kind: input, shape index: {}]   ;;  %s322_s2 = inlined_call_operand.hbm [shape: f32[1,8,128], index: 2, kind: output, shape index: {}]  }
   0x1   :  { %8 = vsyncpa [#allocation6], 0 }
   0x2   :  { %9 = vsyncpa [#allocation4], 0  ;;  %s264_s9 = smov [#allocation2]   ;;  %s192_s13 = scalar_lea.hbm %s320_s0, 256 }
   0x3   :  { %s21_s10 = sshll.u32 %s264_s9, 4  ;;  %p193_p0 = scmp.ne.s32.totalorder %s320_s0, %s192_s13  ;;  %s22_s10 = int_to_ptr.vmem [resolvable:$true] %s21_s10 }
   0x4   :  { %p196_p1 = scmp.lt.u32.totalorder %s192_s13, %s320_s0 }
   0x6   :  { %p198_p2 = pnand %p196_p1, %p193_p0 }
   0x8   :  { %201 = shalt.err (!%p198_p2)
}
   0x9   :  { %s202_s18 = scalar_lea.vmem %s22_s10, 256  ;;  %p207_p4 = scmp.lt.s32.totalorder %s22_s10, %s22_s10 }
   0xa   :  { %p203_p3 = scmp.ne.s32.totalorder %s22_s10, %s202_s18  ;;  %p208_p5 = scmp.lt.s32.totalorder %s202_s18, %s202_s18 }
   0xc   :  { %p209_p6 = por %p208_p5, %p207_p4 }
   0xe   :  { %p210_p7 = pnand %p209_p6, %p203_p3 }
  0x10   :  { %213 = shalt.err (!%p210_p7)
}
  0x11   :  { %s265_s19 = smov 128   ;;  %s266_s20 = smov 8  }
  0x12   :  { %27 = dma.hbm_to_vmem [thread:$0]  %s320_s0, 256, %s22_s10, [#allocation3], %s265_s19, %s265_s19, %s266_s20  }
  0x13   :  { %s267_s23 = smov [#allocation5]   ;;  %s214_s27 = scalar_lea.hbm %s321_s1, 256 }
  0x14   :  { %s39_s24 = sshll.u32 %s267_s23, 4  ;;  %p215_p8 = scmp.ne.s32.totalorder %s321_s1, %s214_s27  ;;  %s40_s24 = int_to_ptr.vmem [resolvable:$true] %s39_s24 }
  0x15   :  { %p218_p9 = scmp.lt.u32.totalorder %s214_s27, %s321_s1 }
  0x17   :  { %p220_p10 = pnand %p218_p9, %p215_p8 }
  0x19   :  { %223 = shalt.err (!%p220_p10)
}
  0x1a   :  { %s224_s4 = scalar_lea.vmem %s40_s24, 256  ;;  %p229_p12 = scmp.lt.s32.totalorder %s40_s24, %s40_s24 }
  0x1b   :  { %p225_p11 = scmp.ne.s32.totalorder %s40_s24, %s224_s4  ;;  %p230_p13 = scmp.lt.s32.totalorder %s224_s4, %s224_s4 }
  0x1d   :  { %p231_p0 = por %p230_p13, %p229_p12 }
  0x1f   :  { %p232_p1 = pnand %p231_p0, %p225_p11 }
  0x21   :  { %235 = shalt.err (!%p232_p1)
}
  0x22   :  { %45 = dma.hbm_to_vmem [thread:$0]  %s321_s1, 256, %s40_s24, [#allocation6], %s265_s19, %s265_s19, %s266_s20  }
  0x23   :  { %258 = dma.done.wait [#allocation3], 256  }
  0x24   :  { %259 = vsyncadd [#allocation3], 4294967040 }
  0x25   :  { %260 = dma.done.wait [#allocation6], 256  }
  0x26   :  { %261 = vsyncadd [#allocation6], 4294967040  ;;  %v66_v0 = vld [vmem:[#allocation2] sm:$0xff]  ;;  %v67_v1 = vld [vmem:[#allocation2 + $0x8] sm:$0xff]  ;;  %s268_s1 = smov [#allocation7]  }
  0x27   :  { %v70_v2 = vand.u32 2147483647, %v66_v0  ;;  %v71_v3 = vand.u32 2147483647, %v67_v1  ;;  %v68_v12 = vld [vmem:[#allocation5] sm:$0xff]  ;;  %v69_v13 = vld [vmem:[#allocation5 + $0x8] sm:$0xff] }
  0x28   :  { %v80_v14 = vsub.f32 0.0, %v66_v0  ;;  %vm78_vm0 = vcmp.ge.f32.partialorder %v68_v12, 0.5  ;;  %v81_v16 = vsub.f32 0.0, %v67_v1  ;;  %vm79_vm1 = vcmp.ge.f32.partialorder %v69_v13, 0.5  ;;  %s156_s6 = sshll.u32 %s268_s1, 4  ;;  %s157_s6 = int_to_ptr.vmem [resolvable:$true] %s156_s6 }
  0x29   :  { %v72_v4 = vsub.f32 0.0, %v70_v2  ;;  %v73_v5 = vsub.f32 0.0, %v71_v3  ;;  %v122_v43 = vmul.f32 0.5, %v68_v12  ;;  %v123_v46 = vmul.f32 0.5, %v69_v13  ;;  %s236_s7 = scalar_lea.vmem %s157_s6, 128  ;;  %p241_p3 = scmp.lt.s32.totalorder %s157_s6, %s157_s6 }
  0x2a   :  { %v82_v20 = vsel %vm78_vm0, %v80_v14, %v66_v0  ;;  %v83_v22 = vsel %vm79_vm1, %v81_v16, %v67_v1  ;;  %p237_p2 = scmp.ne.s32.totalorder %s157_s6, %s236_s7  ;;  %p242_p4 = scmp.lt.s32.totalorder %s236_s7, %s236_s7 }
  0x2b   :  { %v74_v6 = vmul.f32 1.442695, %v72_v4  ;;  %v76_v7 = vmul.f32 1.442695, %v73_v5  ;;  %vm116_vm2 = vcmp.ge.f32.partialorder %v82_v20, 0.0  ;;  %vm117_vm3 = vcmp.ge.f32.partialorder %v83_v22, 0.0 }
  0x2c   :  { %v84_v42 = vmax.f32 %v82_v20, 0.0  ;;  %v85_v44 = vmax.f32 %v83_v22, 0.0  ;;  %v124_v49 = vsub.f32 0.75, %v122_v43  ;;  %v125_v52 = vsub.f32 0.75, %v123_v46  ;;  %p243_p5 = por %p242_p4, %p241_p3 }
  0x2d   :  { %176 = vpow2.f32 %v74_v6 }
  0x2e   :  { %178 = vpow2.f32 %v76_v7  ;;  %p244_p6 = pnand %p243_p5, %p237_p2 }
  0x37   :  { %v177_v8 = vpop.eup %176 }
  0x38   :  { %v179_v9 = vpop.eup %178  ;;  %v86_v10 = vadd.f32 1.0, %v177_v8  ;;  %v89_v23 = vmul.f32 -0.5, %v177_v8  ;;  %v92_v32 = vand.u32 2147483647, %v177_v8 }
  0x39   :  { %v95_v11 = vadd.f32 1.0, %v179_v9  ;;  %v98_v25 = vmul.f32 -0.5, %v179_v9  ;;  %v101_v36 = vand.u32 2147483647, %v179_v9 }
  0x3a   :  { %180 = vrcp.f32 %v86_v10  ;;  %v90_v29 = vadd.f32 1.0, %v89_v23  ;;  %vm93_vm4 = vcmp.lt.f32.partialorder %v92_v32, 0.0004427343 }
  0x3b   :  { %182 = vrcp.f32 %v95_v11  ;;  %v99_v33 = vadd.f32 1.0, %v98_v25  ;;  %vm102_vm5 = vcmp.lt.f32.partialorder %v101_v36, 0.0004427343 }
  0x3c   :  { %184 = vlog2.f32 %v86_v10  ;;  %v91_v39 = vmul.f32 %v177_v8, %v90_v29 }
  0x3d   :  { %186 = vlog2.f32 %v95_v11  ;;  %v100_v41 = vmul.f32 %v179_v9, %v99_v33 }
  0x44   :  { %v181_v15 = vpop.eup %180 }
  0x45   :  { %v183_v17 = vpop.eup %182  ;;  %v110_v18 = vmul.f32 %v181_v15, %v86_v10 }
  0x46   :  { %v111_v19 = vmul.f32 %v183_v17, %v95_v11  ;;  %v185_v31 = vpop.eup %184 }
  0x47   :  { %v112_v21 = vsub.f32 2.0, %v110_v18  ;;  %v187_v35 = vpop.eup %186  ;;  %v88_v38 = vmul.f32 0.6931472, %v185_v31 }
  0x48   :  { %v113_v24 = vsub.f32 2.0, %v111_v19  ;;  %v97_v40 = vmul.f32 0.6931472, %v187_v35 }
  0x49   :  { %v114_v26 = vmul.f32 %v181_v15, %v112_v21  ;;  %v94_v45 = vsel %vm93_vm4, %v91_v39, %v88_v38 }
  0x4a   :  { %v115_v27 = vmul.f32 %v183_v17, %v113_v24  ;;  %v103_v47 = vsel %vm102_vm5, %v100_v41, %v97_v40  ;;  %v104_v48 = vadd.f32 %v94_v45, %v84_v42 }
  0x4b   :  { %v118_v28 = vmul.f32 %v177_v8, %v114_v26  ;;  %v105_v51 = vadd.f32 %v103_v47, %v85_v44 }
  0x4c   :  { %v119_v30 = vmul.f32 %v179_v9, %v115_v27  ;;  %v126_v58 = vmul.f32 %v124_v49, %v104_v48 }
  0x4d   :  { %v120_v34 = vsel %vm116_vm2, %v114_v26, %v118_v28  ;;  %v127_v60 = vmul.f32 %v125_v52, %v105_v51 }
  0x4e   :  { %v121_v37 = vsel %vm117_vm3, %v115_v27, %v119_v30  ;;  %188 = vrsqrt.f32 %v120_v34  ;;  %vm130_vm6 = vcmp.eq.f32.partialorder %v120_v34, inf  ;;  %v133_v53 = vand.u32 2147483648, %v120_v34 }
  0x4f   :  { %190 = vrsqrt.f32 %v121_v37  ;;  %vm132_vm7 = vcmp.eq.f32.partialorder %v120_v34, 0.0  ;;  %vm137_vm8 = vcmp.eq.f32.partialorder %v121_v37, inf  ;;  %v140_v56 = vand.u32 2147483648, %v121_v37 }
  0x50   :  { %vm139_vm9 = vcmp.eq.f32.partialorder %v121_v37, 0.0 }
  0x58   :  { %v189_v50 = vpop.eup %188 }
  0x59   :  { %v191_v54 = vpop.eup %190  ;;  %v129_v55 = vmul.f32 %v189_v50, %v120_v34 }
  0x5a   :  { %v136_v57 = vmul.f32 %v191_v54, %v121_v37 }
  0x5b   :  { %v131_v59 = vsel %vm130_vm6, %v120_v34, %v129_v55 }
  0x5c   :  { %v134_v61 = vsel %vm132_vm7, %v133_v53, %v131_v59  ;;  %v138_v62 = vsel %vm137_vm8, %v121_v37, %v136_v57 }
  0x5d   :  { %v141_v63 = vsel %vm139_vm9, %v140_v56, %v138_v62  ;;  %v142_v0 = vmul.f32 %v134_v61, %v120_v34 }
  0x5e   :  { %v143_v1 = vmul.f32 %v141_v63, %v121_v37 }
  0x5f   :  { %v144_v2 = vmul.f32 %v142_v0, %v126_v58 }
  0x60   :  { %v145_v3 = vmul.f32 %v143_v1, %v127_v60 }
  0x62   :  { %v146_v4 = vadd.f32 %v145_v3, %v144_v2 }
  0x64   :  { %149 = vst [vmem:[#allocation7] sm:$0xff] %v146_v4 }
  0x65   :  { %247 = shalt.err (!%p244_p6)
}
  0x66   :  { %s248_s10 = scalar_lea.hbm %s322_s2, 128 }
  0x67   :  { %p249_p7 = scmp.ne.s32.totalorder %s322_s2, %s248_s10  ;;  %p252_p8 = scmp.lt.u32.totalorder %s248_s10, %s322_s2 }
  0x69   :  { %p254_p9 = pnand %p252_p8, %p249_p7 }
  0x6b   :  { %257 = shalt.err (!%p254_p9)
}
  0x6c   :  { %159 = dma.vmem_to_hbm [thread:$0]  %s157_s6, 128, %s322_s2, [#allocation4]  }
  0x6d   :  { %262 = dma.done.wait [#allocation4], 128  }
  0x6e   :  { %263 = vsyncadd [#allocation4], 4294967168 }
  0x6f   :  { %163 = vsyncpa [#allocation3], 1 }
  0x70   :  { %164 = vsyncpa [#allocation6], 1 }
  0x71   :  { %165 = vsyncpa [#allocation4], 1 }

</bundles_post_ra>
